<compile_context>
chip_gen: v6e
topology: v6e:2x2x1
jax: 0.10.0
libtpu: 0.0.40
codegen_flags: <defaults>
</compile_context>

<pallas_src>
import jax
import jax.numpy as jnp
from jax.experimental import pallas as pl
from jax.experimental.pallas import tpu as pltpu

IN_FEATURES = 9
OUT_FEATURES = 5


def _linear_kernel(x_ref, w_ref, b_ref, y_ref):
    """y = x @ w_t + b on one (TB, 9) row block. MXU matmul, f32 accumulation."""
    acc = jnp.dot(x_ref[...], w_ref[...], preferred_element_type=jnp.float32)  # (TB, 5)
    y_ref[...] = (acc + b_ref[...].astype(jnp.float32)).astype(y_ref.dtype)


def small_model_forward(x, weight, bias, *, max_tile_b=8192, xla_fallback_batch=0):
    """Equivalent of SmallModel.forward: y = x @ weight.T + bias.

    x: (batch, 9), weight: (5, 9), bias: (5,)  ->  (batch, 5)
    `max_tile_b` must be a multiple of 8 (default 8192).
    """
    batch, in_f = x.shape
    out_f, in_f2 = weight.shape
    assert in_f == IN_FEATURES and in_f2 == IN_FEATURES and out_f == OUT_FEATURES
    assert max_tile_b % 8 == 0

    # Optional: a single fused XLA op beats any kernel launch at tiny batch.
    if batch <= xla_fallback_batch:
        return (x @ weight.T + bias.reshape(1, -1)).astype(x.dtype)

    w_t = jnp.transpose(weight).astype(x.dtype)              # (9, 5)  — tiny
    b2d = jnp.reshape(bias, (1, OUT_FEATURES)).astype(x.dtype)  # (1, 5)

    # Row tile: full array if it fits (always a legal block shape), else a
    # multiple-of-8 tile; the ragged last block is handled by Pallas (masked).
    tb = batch if batch <= max_tile_b else max_tile_b
    grid = (pl.cdiv(batch, tb),)

    itemsize = jnp.dtype(x.dtype).itemsize
    cost = pl.CostEstimate(
        flops=2 * batch * IN_FEATURES * OUT_FEATURES,
        transcendentals=0,
        bytes_accessed=(batch * (IN_FEATURES + OUT_FEATURES)
                        + IN_FEATURES * OUT_FEATURES + OUT_FEATURES) * itemsize,
    )

    return pl.pallas_call(
        _linear_kernel,
        out_shape=jax.ShapeDtypeStruct((batch, OUT_FEATURES), x.dtype),
        grid=grid,
        in_specs=[
            # x: (TB, 9) row block straight from HBM (no relayout).
            pl.BlockSpec((tb, IN_FEATURES), lambda i: (i, 0)),
            # Weight^T: tiny, constant block resident across the whole grid.
            pl.BlockSpec((IN_FEATURES, OUT_FEATURES), lambda i: (0, 0)),
            # Bias as a (1, 5) row, broadcast-added on the VPU.
            pl.BlockSpec((1, OUT_FEATURES), lambda i: (0, 0)),
        ],
        out_specs=pl.BlockSpec((tb, OUT_FEATURES), lambda i: (i, 0)),
        compiler_params=pltpu.CompilerParams(
            dimension_semantics=("parallel",),      # batch loop shards over v7x's 2 TCs
            vmem_limit_bytes=32 * 1024 * 1024,      # safe on v5e/v6e/v7x with TB<=8192
        ),
        cost_estimate=cost,
    )(x, w_t, b2d)


if __name__ == "__main__":
    key = jax.random.PRNGKey(0)
    k_x, k_w, k_b, k_x2 = jax.random.split(key, 4)

    # Same init family as torch.nn.Linear: U(-1/sqrt(fan_in), 1/sqrt(fan_in)).
    bound = 1.0 / (IN_FEATURES ** 0.5)
    weight = jax.random.uniform(
        k_w, (OUT_FEATURES, IN_FEATURES), jnp.float32, -bound, bound)
    bias = jax.random.uniform(k_b, (OUT_FEATURES,), jnp.float32, -bound, bound)

    # Small batch: single full-array block.
    batch = 16
    x = jax.random.normal(k_x, (batch, IN_FEATURES), dtype=jnp.float32)
    y = jax.block_until_ready(small_model_forward(x, weight, bias))
    y_ref = x @ weight.T + bias
    assert y.shape == (batch, OUT_FEATURES)
    assert jnp.allclose(y, y_ref, atol=1e-5, rtol=1e-5), "mismatch (single block)"

    # Multi-step grid with a ragged last tile (exercises tiling + masked edge).
    batch2 = 600
    x2 = jax.random.normal(k_x2, (batch2, IN_FEATURES), dtype=jnp.float32)
    y2 = jax.block_until_ready(small_model_forward(x2, weight, bias, max_tile_b=256))
    y2_ref = x2 @ weight.T + bias
    assert y2.shape == (batch2, OUT_FEATURES)
    assert jnp.allclose(y2, y2_ref, atol=1e-5, rtol=1e-5), "mismatch (ragged grid)"

    print("KERNEL_OK")
</pallas_src>

<mosaic_0001>
module attributes {stable_mosaic.version = 11 : i64} {
  func.func @_linear_kernel(%arg0: i32, %arg1: memref<16x9xf32, #tpu.memory_space<vmem>>, %arg2: memref<9x5xf32, #tpu.memory_space<vmem>>, %arg3: memref<1x5xf32, #tpu.memory_space<vmem>>, %arg4: memref<16x5xf32, #tpu.memory_space<vmem>>) attributes {dimension_semantics = [#tpu.dimension_semantics<parallel>], iteration_bounds = array<i64: 1>, scalar_prefetch = 0 : i64, scratch_operands = 0 : i64, tpu.core_type = #tpu.core_type<tc>, window_params = [{transform_indices = @transform_0, window_bounds = array<i64: 16, 9>}, {pipeline_mode = #tpu.pipeline_mode<synchronous>, transform_indices = @transform_1, window_bounds = array<i64: 9, 5>}, {pipeline_mode = #tpu.pipeline_mode<synchronous>, transform_indices = @transform_2, window_bounds = array<i64: 1, 5>}, {transform_indices = @transform_3, window_bounds = array<i64: 16, 5>}]} {
    %c0 = arith.constant 0 : index
    %c0_0 = arith.constant 0 : index
    %0 = vector.load %arg1[%c0, %c0_0] : memref<16x9xf32, #tpu.memory_space<vmem>>, vector<16x9xf32>
    %c0_1 = arith.constant 0 : index
    %c0_2 = arith.constant 0 : index
    %1 = vector.load %arg2[%c0_1, %c0_2] : memref<9x5xf32, #tpu.memory_space<vmem>>, vector<9x5xf32>
    %cst = arith.constant dense<0.000000e+00> : vector<16x5xf32>
    %2 = tpu.matmul %0, %1, %cst {dimension_numbers = #tpu.dot_dimension_numbers<[1], [0], [0], [1], [0, 0, 1, 1], [], []>} : vector<16x9xf32>, vector<9x5xf32>, vector<16x5xf32> -> vector<16x5xf32>
    %c0_3 = arith.constant 0 : index
    %c0_4 = arith.constant 0 : index
    %3 = vector.load %arg3[%c0_3, %c0_4] : memref<1x5xf32, #tpu.memory_space<vmem>>, vector<1x5xf32>
    %4 = vector.broadcast %3 : vector<1x5xf32> to vector<16x5xf32>
    %5 = arith.addf %2, %4 : vector<16x5xf32>
    %c0_5 = arith.constant 0 : index
    %c0_6 = arith.constant 0 : index
    %6 = vector.load %arg4[%c0_5, %c0_6] : memref<16x5xf32, #tpu.memory_space<vmem>>, vector<16x5xf32>
    tpu.vector_store %arg4[%c0_5, %c0_6], %5 {strides = array<i32>} : memref<16x5xf32, #tpu.memory_space<vmem>>, vector<16x5xf32>,
    return
  }
  func.func @transform_0(%arg0: i32) -> (i32, i32) {
    %c0_i32 = arith.constant 0 : i32
    %c0_i32_0 = arith.constant 0 : i32
    return %arg0, %c0_i32 : i32, i32
  }
  func.func @transform_1(%arg0: i32) -> (i32, i32) {
    %c0_i32 = arith.constant 0 : i32
    %c0_i32_0 = arith.constant 0 : i32
    %c0_i32_1 = arith.constant 0 : i32
    return %c0_i32, %c0_i32_0 : i32, i32
  }
  func.func @transform_2(%arg0: i32) -> (i32, i32) {
    %c0_i32 = arith.constant 0 : i32
    %c0_i32_0 = arith.constant 0 : i32
    %c0_i32_1 = arith.constant 0 : i32
    return %c0_i32, %c0_i32_0 : i32, i32
  }
  func.func @transform_3(%arg0: i32) -> (i32, i32) {
    %c0_i32 = arith.constant 0 : i32
    %c0_i32_0 = arith.constant 0 : i32
    return %arg0, %c0_i32 : i32, i32
  }
}

</mosaic_0001>

<bundles_post_ra>
// kernel: tpu_custom_call.1
= control target key start
LH: loop header
LB: loop body
LE: loop exit
PB: predicated region body
PF: predicated region fallthrough
CT: control target
= control target key end

     0   :  { %vm32_vm0 = vcmask 1040384   ;;  %vm25_vm1 = vcmask 72704   ;;  %vm111_vm2 = vcmask 39936   ;;  %s174_s1 = inlined_call_operand.vmem [shape: f32[9,5], index: 1, kind: input, shape index: {}]   ;;  %s175_s0 = inlined_call_operand.vmem [shape: f32[16,9], index: 0, kind: input, shape index: {}]   ;;  %s176_s2 = inlined_call_operand.vmem [shape: f32[1,5], index: 2, kind: input, shape index: {}]   ;;  %s177_s3 = inlined_call_operand.vmem [shape: f32[16,5], index: 3, kind: output, shape index: {}]  }
   0x1   :  { %v17_v0 = vld [vmem:[%s174_s1 + $0x8] sm:$0x1]  ;;  %v16_v1 = vld [vmem:[%s174_s1] sm:$0xff] }
   0x2   :  { %v14_v2 = vld [vmem:[%s175_s0] sm:$0xff]  ;;  %126 = vmatprep.subr.msk.mxu0 %vm32_vm0, %v17_v0  ;;  %v15_v3 = vld [vmem:[%s175_s0 + $0x8] sm:$0xff] }
   0x3   :  { %130 = vmatprep.mubr.msk.f32.mxu0 %vm25_vm1, %v14_v2  ;;  %127 = vmatpush3.msk.msra.mxu0 %vm32_vm0, %v17_v0  ;;  %v118_v4 = vld [vmem:[%s176_s2] ss:$0 sm:$0xff] }
   0x4   :  { %128 = vmatprep.subr.mxu0 %v16_v1 }
   0x5   :  { %129 = vmatpush3.msra.mxu0 %v16_v1 }
   0x6   :  { %131 = vmatmul.mubr.msk.f32.vlgmr.msra.gmra.mxu0 %vm25_vm1, %v15_v3 }
  0xc6   :  { %v132_v5 = vpop.f32.mrf.mxu0 }
  0xc7   :  { %v108_v6 = vadd.f32 %v132_v5, %v118_v4 }
  0xc8   :  { %v102_v7 = vpop.f32.mrf.mxu0 }
  0xc9   :  { %113 = vst.msk [vmem:[%s177_s3 + $0x8] sm:$0xff] %vm111_vm2, %v108_v6  ;;  %v103_v8 = vadd.f32 %v118_v4, %v102_v7 }
  0xcb   :  { %112 = vst.msk [vmem:[%s177_s3] sm:$0xff] %vm111_vm2, %v103_v8 }

</bundles_post_ra>
